<compile_context>
chip_gen: v6e
topology: v6e:2x2x1
jax: 0.10.0
libtpu: 0.0.40
codegen_flags: <defaults>
</compile_context>

<pallas_src>
import jax
import jax.numpy as jnp
from jax.experimental import pallas as pl
from jax.experimental.pallas import tpu as pltpu

KERNEL_SIZE = 7
PAD = 3  # padding = 3 for kernel_size 7


def spatial_attention_kernel(w_ref, x_ref, o_ref):
    # w_ref : SMEM (2*K,) f32  -- [0:K]  avg taps pre-scaled by 1/C,
    #                             [K:2K] max taps
    # x_ref : VMEM (B, C, L)    -- B batch rows of the input
    # o_ref : VMEM (B, L)       -- sigmoid attention map (lane+sublane dense)
    x = x_ref[...]                                        # (B, C, L), native dtype
    s = jnp.sum(x.astype(jnp.float32), axis=1)            # (B, L) f32 channel sum
    m = jnp.max(x, axis=1).astype(jnp.float32)            # (B, L) channel max

    B, L = o_ref.shape
    lane = jax.lax.broadcasted_iota(jnp.int32, (B, L), 1)  # lane index, hoisted

    acc = jnp.zeros((B, L), jnp.float32)
    for k in range(KERNEL_SIZE):                           # static 7-tap unroll
        # combine both conv input channels for this tap, then shift once
        t = w_ref[k] * s + w_ref[KERNEL_SIZE + k] * m      # (B, L)
        shift = PAD - k                                    # out[i] += w[k]*feat[i+k-PAD]
        if shift != 0:
            t = pltpu.roll(t, shift % L, axis=1)           # XLU lane rotate
            # zero the wrapped lanes -> emulates the conv's zero padding
            if shift > 0:
                t = jnp.where(lane >= shift, t, 0.0)
            else:
                t = jnp.where(lane < L + shift, t, 0.0)
        acc = acc + t

    o_ref[...] = jax.nn.sigmoid(acc).astype(o_ref.dtype)


def _pick_batch_block(N, C, L, itemsize, cap_bytes=8 << 20):
    """Rows per grid step: as big as fits ~cap_bytes per input block (v7x-safe)."""
    per_row = max(1, C * L * itemsize)
    b = max(1, cap_bytes // per_row)
    if b >= N or N <= 8:
        return N                       # full batch in one block (always a legal block dim)
    return max(8, (min(b, N) // 8) * 8)  # partial blocks: keep output sublane dim % 8 == 0


def spatial_attention(x, w):
    """x: (N, C, L); w: (1, 2, KERNEL_SIZE) Conv1d weight (out=1, in=2, k), no bias."""
    N, C, L = x.shape
    B = _pick_batch_block(N, C, L, jnp.dtype(x.dtype).itemsize)

    # Flat 1-D SMEM weights: avg taps folded with the 1/C of the mean, then max taps.
    w_flat = jnp.concatenate(
        [w[0, 0, :].astype(jnp.float32) / jnp.float32(C),
         w[0, 1, :].astype(jnp.float32)]
    )

    # NOTE: for very large C*L a further L-tiling (with a PAD-wide halo) or a C-split
    # reduction axis would be needed to stay in VMEM; not required at these sizes.
    out2d = pl.pallas_call(
        spatial_attention_kernel,
        out_shape=jax.ShapeDtypeStruct((N, L), x.dtype),
        grid=(pl.cdiv(N, B),),
        in_specs=[
            pl.BlockSpec(memory_space=pltpu.MemorySpace.SMEM),   # conv weights (scalars)
            pl.BlockSpec((B, C, L), lambda n: (n, 0, 0)),        # B batch rows, full C & L
        ],
        out_specs=pl.BlockSpec((B, L), lambda n: (n, 0)),        # dense (B, L) output block
        compiler_params=pltpu.CompilerParams(
            dimension_semantics=("parallel",),
            vmem_limit_bytes=32 * 1024 * 1024,
        ),
    )(w_flat, x)

    return out2d.reshape(N, 1, L)


def spatial_attention_ref(x, w):
    """Pure-JAX reference mirroring the PyTorch forward."""
    avg = jnp.mean(x, axis=1, keepdims=True)
    mx = jnp.max(x, axis=1, keepdims=True)
    cat = jnp.concatenate([avg, mx], axis=1)                     # (N, 2, L)
    y = jax.lax.conv_general_dilated(
        cat, w, window_strides=(1,), padding=[(PAD, PAD)],
        dimension_numbers=("NCH", "OIH", "NCH"))
    return jax.nn.sigmoid(y)


if __name__ == "__main__":
    key = jax.random.PRNGKey(0)
    kx, kw = jax.random.split(key)

    # Small NCL input; L=128 keeps the lane dimension TPU-friendly.
    x = jax.random.normal(kx, (2, 4, 128), dtype=jnp.float32)
    # Deterministic Conv1d weight, shape (out_ch=1, in_ch=2, k=7), no bias.
    w = jax.random.normal(kw, (1, 2, KERNEL_SIZE), dtype=jnp.float32) * 0.2

    out = jax.block_until_ready(spatial_attention(x, w))
    ref = spatial_attention_ref(x, w)

    assert out.shape == (2, 1, 128)
    assert jnp.allclose(out, ref, atol=1e-5, rtol=1e-5), "mismatch vs reference"

    print("KERNEL_OK")
</pallas_src>

<mosaic_0001>
module attributes {stable_mosaic.version = 11 : i64} {
  func.func @spatial_attention_kernel(%arg0: i32, %arg1: memref<14xf32, #tpu.memory_space<smem>>, %arg2: memref<2x4x128xf32, #tpu.memory_space<vmem>>, %arg3: memref<2x128xf32, #tpu.memory_space<vmem>>) attributes {dimension_semantics = [#tpu.dimension_semantics<parallel>], iteration_bounds = array<i64: 1>, scalar_prefetch = 0 : i64, scratch_operands = 0 : i64, tpu.core_type = #tpu.core_type<tc>, window_params = [{transform_indices = @transform_0, window_bounds = array<i64: 14>}, {transform_indices = @transform_1, window_bounds = array<i64: 2, 4, 128>}, {transform_indices = @transform_2, window_bounds = array<i64: 2, 128>}]} {
    %c0 = arith.constant 0 : index
    %c0_0 = arith.constant 0 : index
    %c0_1 = arith.constant 0 : index
    %0 = vector.load %arg2[%c0, %c0_0, %c0_1] : memref<2x4x128xf32, #tpu.memory_space<vmem>>, vector<2x4x128xf32>
    %cst = arith.constant dense<0.000000e+00> : vector<2x128xf32>
    %1 = vector.multi_reduction <add>, %0, %cst [1] : vector<2x4x128xf32> to vector<2x128xf32>
    %cst_2 = arith.constant dense<0xFF800000> : vector<2x128xf32>
    %2 = vector.multi_reduction <maximumf>, %0, %cst_2 [1] : vector<2x4x128xf32> to vector<2x128xf32>
    %3 = tpu.iota {dimensions = array<i32: 1>} : vector<2x128xi32>
    %cst_3 = arith.constant 0.000000e+00 : f32
    %4 = vector.broadcast %cst_3 : f32 to vector<2x128xf32>
    %c0_4 = arith.constant 0 : index
    %5 = memref.load %arg1[%c0_4] : memref<14xf32, #tpu.memory_space<smem>>
    %6 = vector.broadcast %5 : f32 to vector<2x128xf32>
    %7 = arith.mulf %6, %1 : vector<2x128xf32>
    %c7 = arith.constant 7 : index
    %8 = memref.load %arg1[%c7] : memref<14xf32, #tpu.memory_space<smem>>
    %9 = vector.broadcast %8 : f32 to vector<2x128xf32>
    %10 = arith.mulf %9, %2 : vector<2x128xf32>
    %11 = arith.addf %7, %10 : vector<2x128xf32>
    %c3_i32 = arith.constant 3 : i32
    %12 = tpu.dynamic_rotate %11 by %c3_i32 dim 1 : vector<2x128xf32>, i32 -> vector<2x128xf32>
    %c3_i32_5 = arith.constant 3 : i32
    %13 = vector.broadcast %c3_i32_5 : i32 to vector<2x128xi32>
    %14 = arith.cmpi sge, %3, %13 : vector<2x128xi32>
    %cst_6 = arith.constant 0.000000e+00 : f32
    %15 = vector.broadcast %cst_6 : f32 to vector<2x128xf32>
    %16 = arith.select %14, %12, %15 : vector<2x128xi1>, vector<2x128xf32>
    %17 = arith.addf %4, %16 : vector<2x128xf32>
    %c1 = arith.constant 1 : index
    %18 = memref.load %arg1[%c1] : memref<14xf32, #tpu.memory_space<smem>>
    %19 = vector.broadcast %18 : f32 to vector<2x128xf32>
    %20 = arith.mulf %19, %1 : vector<2x128xf32>
    %c8 = arith.constant 8 : index
    %21 = memref.load %arg1[%c8] : memref<14xf32, #tpu.memory_space<smem>>
    %22 = vector.broadcast %21 : f32 to vector<2x128xf32>
    %23 = arith.mulf %22, %2 : vector<2x128xf32>
    %24 = arith.addf %20, %23 : vector<2x128xf32>
    %c2_i32 = arith.constant 2 : i32
    %25 = tpu.dynamic_rotate %24 by %c2_i32 dim 1 : vector<2x128xf32>, i32 -> vector<2x128xf32>
    %c2_i32_7 = arith.constant 2 : i32
    %26 = vector.broadcast %c2_i32_7 : i32 to vector<2x128xi32>
    %27 = arith.cmpi sge, %3, %26 : vector<2x128xi32>
    %cst_8 = arith.constant 0.000000e+00 : f32
    %28 = vector.broadcast %cst_8 : f32 to vector<2x128xf32>
    %29 = arith.select %27, %25, %28 : vector<2x128xi1>, vector<2x128xf32>
    %30 = arith.addf %17, %29 : vector<2x128xf32>
    %c2 = arith.constant 2 : index
    %31 = memref.load %arg1[%c2] : memref<14xf32, #tpu.memory_space<smem>>
    %32 = vector.broadcast %31 : f32 to vector<2x128xf32>
    %33 = arith.mulf %32, %1 : vector<2x128xf32>
    %c9 = arith.constant 9 : index
    %34 = memref.load %arg1[%c9] : memref<14xf32, #tpu.memory_space<smem>>
    %35 = vector.broadcast %34 : f32 to vector<2x128xf32>
    %36 = arith.mulf %35, %2 : vector<2x128xf32>
    %37 = arith.addf %33, %36 : vector<2x128xf32>
    %c1_i32 = arith.constant 1 : i32
    %38 = tpu.dynamic_rotate %37 by %c1_i32 dim 1 : vector<2x128xf32>, i32 -> vector<2x128xf32>
    %c1_i32_9 = arith.constant 1 : i32
    %39 = vector.broadcast %c1_i32_9 : i32 to vector<2x128xi32>
    %40 = arith.cmpi sge, %3, %39 : vector<2x128xi32>
    %cst_10 = arith.constant 0.000000e+00 : f32
    %41 = vector.broadcast %cst_10 : f32 to vector<2x128xf32>
    %42 = arith.select %40, %38, %41 : vector<2x128xi1>, vector<2x128xf32>
    %43 = arith.addf %30, %42 : vector<2x128xf32>
    %c3 = arith.constant 3 : index
    %44 = memref.load %arg1[%c3] : memref<14xf32, #tpu.memory_space<smem>>
    %45 = vector.broadcast %44 : f32 to vector<2x128xf32>
    %46 = arith.mulf %45, %1 : vector<2x128xf32>
    %c10 = arith.constant 10 : index
    %47 = memref.load %arg1[%c10] : memref<14xf32, #tpu.memory_space<smem>>
    %48 = vector.broadcast %47 : f32 to vector<2x128xf32>
    %49 = arith.mulf %48, %2 : vector<2x128xf32>
    %50 = arith.addf %46, %49 : vector<2x128xf32>
    %51 = arith.addf %43, %50 : vector<2x128xf32>
    %c4 = arith.constant 4 : index
    %52 = memref.load %arg1[%c4] : memref<14xf32, #tpu.memory_space<smem>>
    %53 = vector.broadcast %52 : f32 to vector<2x128xf32>
    %54 = arith.mulf %53, %1 : vector<2x128xf32>
    %c11 = arith.constant 11 : index
    %55 = memref.load %arg1[%c11] : memref<14xf32, #tpu.memory_space<smem>>
    %56 = vector.broadcast %55 : f32 to vector<2x128xf32>
    %57 = arith.mulf %56, %2 : vector<2x128xf32>
    %58 = arith.addf %54, %57 : vector<2x128xf32>
    %c127_i32 = arith.constant 127 : i32
    %59 = tpu.dynamic_rotate %58 by %c127_i32 dim 1 : vector<2x128xf32>, i32 -> vector<2x128xf32>
    %c127_i32_11 = arith.constant 127 : i32
    %60 = vector.broadcast %c127_i32_11 : i32 to vector<2x128xi32>
    %61 = arith.cmpi slt, %3, %60 : vector<2x128xi32>
    %cst_12 = arith.constant 0.000000e+00 : f32
    %62 = vector.broadcast %cst_12 : f32 to vector<2x128xf32>
    %63 = arith.select %61, %59, %62 : vector<2x128xi1>, vector<2x128xf32>
    %64 = arith.addf %51, %63 : vector<2x128xf32>
    %c5 = arith.constant 5 : index
    %65 = memref.load %arg1[%c5] : memref<14xf32, #tpu.memory_space<smem>>
    %66 = vector.broadcast %65 : f32 to vector<2x128xf32>
    %67 = arith.mulf %66, %1 : vector<2x128xf32>
    %c12 = arith.constant 12 : index
    %68 = memref.load %arg1[%c12] : memref<14xf32, #tpu.memory_space<smem>>
    %69 = vector.broadcast %68 : f32 to vector<2x128xf32>
    %70 = arith.mulf %69, %2 : vector<2x128xf32>
    %71 = arith.addf %67, %70 : vector<2x128xf32>
    %c126_i32 = arith.constant 126 : i32
    %72 = tpu.dynamic_rotate %71 by %c126_i32 dim 1 : vector<2x128xf32>, i32 -> vector<2x128xf32>
    %c126_i32_13 = arith.constant 126 : i32
    %73 = vector.broadcast %c126_i32_13 : i32 to vector<2x128xi32>
    %74 = arith.cmpi slt, %3, %73 : vector<2x128xi32>
    %cst_14 = arith.constant 0.000000e+00 : f32
    %75 = vector.broadcast %cst_14 : f32 to vector<2x128xf32>
    %76 = arith.select %74, %72, %75 : vector<2x128xi1>, vector<2x128xf32>
    %77 = arith.addf %64, %76 : vector<2x128xf32>
    %c6 = arith.constant 6 : index
    %78 = memref.load %arg1[%c6] : memref<14xf32, #tpu.memory_space<smem>>
    %79 = vector.broadcast %78 : f32 to vector<2x128xf32>
    %80 = arith.mulf %79, %1 : vector<2x128xf32>
    %c13 = arith.constant 13 : index
    %81 = memref.load %arg1[%c13] : memref<14xf32, #tpu.memory_space<smem>>
    %82 = vector.broadcast %81 : f32 to vector<2x128xf32>
    %83 = arith.mulf %82, %2 : vector<2x128xf32>
    %84 = arith.addf %80, %83 : vector<2x128xf32>
    %c125_i32 = arith.constant 125 : i32
    %85 = tpu.dynamic_rotate %84 by %c125_i32 dim 1 : vector<2x128xf32>, i32 -> vector<2x128xf32>
    %c125_i32_15 = arith.constant 125 : i32
    %86 = vector.broadcast %c125_i32_15 : i32 to vector<2x128xi32>
    %87 = arith.cmpi slt, %3, %86 : vector<2x128xi32>
    %cst_16 = arith.constant 0.000000e+00 : f32
    %88 = vector.broadcast %cst_16 : f32 to vector<2x128xf32>
    %89 = arith.select %87, %85, %88 : vector<2x128xi1>, vector<2x128xf32>
    %90 = arith.addf %77, %89 : vector<2x128xf32>
    %91 = arith.negf %90 : vector<2x128xf32>
    %92 = math.exp %91 : vector<2x128xf32>
    %cst_17 = arith.constant 1.000000e+00 : f32
    %93 = vector.broadcast %cst_17 : f32 to vector<2x128xf32>
    %94 = arith.addf %93, %92 : vector<2x128xf32>
    %95 = arith.divf %93, %94 : vector<2x128xf32>
    %c0_18 = arith.constant 0 : index
    %c0_19 = arith.constant 0 : index
    %96 = vector.load %arg3[%c0_18, %c0_19] : memref<2x128xf32, #tpu.memory_space<vmem>>, vector<2x128xf32>
    tpu.vector_store %arg3[%c0_18, %c0_19], %95 {strides = array<i32>} : memref<2x128xf32, #tpu.memory_space<vmem>>, vector<2x128xf32>,
    return
  }
  func.func @transform_0(%arg0: i32) -> i32 {
    %c0_i32 = arith.constant 0 : i32
    %c0_i32_0 = arith.constant 0 : i32
    return %c0_i32 : i32
  }
  func.func @transform_1(%arg0: i32) -> (i32, i32, i32) {
    %c0_i32 = arith.constant 0 : i32
    %c0_i32_0 = arith.constant 0 : i32
    %c0_i32_1 = arith.constant 0 : i32
    return %arg0, %c0_i32, %c0_i32_0 : i32, i32, i32
  }
  func.func @transform_2(%arg0: i32) -> (i32, i32) {
    %c0_i32 = arith.constant 0 : i32
    %c0_i32_0 = arith.constant 0 : i32
    return %arg0, %c0_i32 : i32, i32
  }
}

</mosaic_0001>

<bundles_post_ra>
// kernel: tpu_custom_call.1
= control target key start
LH: loop header
LB: loop body
LE: loop exit
PB: predicated region body
PF: predicated region fallthrough
CT: control target
= control target key end

     0   :  { %7 = vsyncpa [#allocation5], 0  ;;  %s426_s0 = inlined_call_operand.hbm [shape: f32[14], index: 0, kind: input, shape index: {}]   ;;  %s427_s1 = inlined_call_operand.hbm [shape: f32[2,4,128], index: 1, kind: input, shape index: {}]   ;;  %s428_s2 = inlined_call_operand.hbm [shape: f32[2,128], index: 2, kind: output, shape index: {}]  }
   0x1   :  { %8 = vsyncpa [#allocation3], 0 }
   0x2   :  { %9 = vsyncpa [#allocation4], 0  ;;  %s306_s9 = smov [#allocation2]   ;;  %s307_s12 = smov [#allocation6]  }
   0x3   :  { %17 = dma.hbm_to_smem %s426_s0, 16, %s306_s9, [#allocation5]  }
   0x4   :  { %s23_s13 = sshll.u32 %s307_s12, 4  ;;  %s24_s13 = int_to_ptr.vmem [resolvable:$true] %s23_s13 }
   0x5   :  { %s268_s14 = scalar_lea.vmem %s24_s13, 128  ;;  %p273_p1 = scmp.lt.s32.totalorder %s24_s13, %s24_s13 }
   0x6   :  { %p269_p0 = scmp.ne.s32.totalorder %s24_s13, %s268_s14  ;;  %p274_p2 = scmp.lt.s32.totalorder %s268_s14, %s268_s14 }
   0x8   :  { %p275_p3 = por %p274_p2, %p273_p1 }
   0xa   :  { %p276_p4 = pnand %p275_p3, %p269_p0 }
   0xc   :  { %279 = shalt.err (!%p276_p4)
}
   0xd   :  { %s308_s15 = smov 64   ;;  %s309_s16 = smov 4  }
   0xe   :  { %29 = dma.hbm_to_vmem [thread:$0]  %s427_s1, 128, %s24_s13, [#allocation3], %s308_s15, %s308_s15, %s309_s16  }
   0xf   :  { %300 = dma.done.wait [#allocation5], 16  }
  0x10   :  { %301 = vsyncadd [#allocation5], 4294967280 }
  0x11   :  { %302 = dma.done.wait [#allocation3], 128  }
  0x12   :  { %303 = vsyncadd [#allocation3], 4294967168 }
  0x13   :  { %36 = sfence }
  0x14   :  { %v37_v0 = vld [vmem:[#allocation6] sm:$0xf]  ;;  %v38_v1 = vld [vmem:[#allocation6 + $0x4] sm:$0xf]  ;;  %vm39_vm0 = vcmask 1043456   ;;  %s338_s0 = sld [smem:[#allocation2]] }
  0x15   :  { %v40_v2 = vsel %vm39_vm0, %v37_v0, 0.0  ;;  %v47_v3 = vsel %vm39_vm0, %v38_v1, 0.0  ;;  %v54_v4 = vsel %vm39_vm0, %v37_v0, -inf  ;;  %v61_v5 = vsel %vm39_vm0, %v38_v1, -inf  ;;  %s340_s19 = sld [smem:[#allocation2 + $0x7]]  ;;  %s310_s3 = smov 3  }
  0x16   :  { %v41_v6 = vrot.slane %v40_v2, 4  ;;  %v48_v7 = vrot.slane %v47_v3, 4  ;;  %v55_v8 = vrot.slane %v54_v4, 4  ;;  %v62_v9 = vrot.slane %v61_v5, 4  ;;  %s342_s1 = sld [smem:[#allocation2 + $0x1]]  ;;  %s311_s4 = smov 1  }
  0x17   :  { %s344_s20 = sld [smem:[#allocation2 + $0x8]]  ;;  %vm82_vm1 = vcmask 1041409   ;;  %s312_s5 = smov 2  }
  0x18   :  { %v42_v10 = vadd.f32 %v41_v6, %v40_v2  ;;  %v49_v11 = vadd.f32 %v48_v7, %v47_v3  ;;  %v56_v12 = vmax.f32 %v54_v4, %v55_v8  ;;  %v63_v13 = vmax.f32 %v61_v5, %v62_v9  ;;  %s346_s21 = sld [smem:[#allocation2 + $0x2]]  ;;  %s313_s6 = smov 127  }
  0x19   :  { %s348_s22 = sld [smem:[#allocation2 + $0x9]]  ;;  %s314_s7 = smov 126  }
  0x1a   :  { %v43_v14 = vrot.slane %v42_v10, 2  ;;  %v50_v15 = vrot.slane %v49_v11, 2  ;;  %v57_v16 = vrot.slane %v56_v12, 2  ;;  %v64_v17 = vrot.slane %v63_v13, 2  ;;  %s350_s23 = sld [smem:[#allocation2 + $0x4]]  ;;  %s315_s8 = smov 125  }
  0x1b   :  { %s352_s24 = sld [smem:[#allocation2 + $0xb]]  ;;  %v71_v26 = vstv %s338_s0  ;;  %v75_v27 = vstv %s340_s19  ;;  %s316_s9 = smov [#allocation7]  }
  0x1c   :  { %v44_v18 = vadd.f32 %v43_v14, %v42_v10  ;;  %v51_v19 = vadd.f32 %v50_v15, %v49_v11  ;;  %v58_v20 = vmax.f32 %v56_v12, %v57_v16  ;;  %v65_v21 = vmax.f32 %v63_v13, %v64_v17  ;;  %s354_s25 = sld [smem:[#allocation2 + $0x5]]  ;;  %s213_s10 = sshll.u32 %s316_s9, 4  ;;  %s214_s10 = int_to_ptr.vmem [resolvable:$true] %s213_s10 }
  0x1d   :  { %v91_v28 = vstv %s342_s1  ;;  %v95_v29 = vstv %s344_s20  ;;  %s360_s26 = sld [smem:[#allocation2 + $0xc]]  ;;  %s280_s11 = scalar_lea.vmem %s214_s10, 32 }
  0x1e   :  { %v45_v22 = vrot.slane %v44_v18, 1  ;;  %v52_v23 = vrot.slane %v51_v19, 1  ;;  %v59_v24 = vrot.slane %v58_v20, 1  ;;  %v66_v25 = vrot.slane %v65_v21, 1  ;;  %s370_s27 = sld [smem:[#allocation2 + $0x6]]  ;;  %p281_p5 = scmp.ne.s32.totalorder %s214_s10, %s280_s11 }
  0x1f   :  { %v110_v34 = vstv %s346_s21  ;;  %v114_v35 = vstv %s348_s22  ;;  %s375_s28 = sld [smem:[#allocation2 + $0xd]]  ;;  %p285_p6 = scmp.lt.s32.totalorder %s214_s10, %s214_s10 }
  0x20   :  { %v362_v30 = vadd.f32 %v45_v22, %v44_v18  ;;  %v364_v31 = vadd.f32 %v52_v23, %v51_v19  ;;  %v366_v32 = vmax.f32 %v58_v20, %v59_v24  ;;  %v368_v33 = vmax.f32 %v65_v21, %v66_v25  ;;  %s381_s29 = sld [smem:[#allocation2 + $0x3]]  ;;  %p286_p7 = scmp.lt.s32.totalorder %s280_s11, %s280_s11 }
  0x21   :  { %v144_v36 = vstv %s350_s23  ;;  %s387_s30 = sld [smem:[#allocation2 + $0xa]]  ;;  %v148_v56 = vstv %s352_s24 }
  0x22   :  { %v72_v37 = vmul.f32 %v71_v26, %v362_v30  ;;  %v73_v38 = vmul.f32 %v71_v26, %v364_v31  ;;  %v76_v39 = vmul.f32 %v75_v27, %v366_v32  ;;  %v77_v40 = vmul.f32 %v75_v27, %v368_v33  ;;  %p287_p8 = por %p286_p7, %p285_p6 }
  0x23   :  { %v92_v41 = vmul.f32 %v91_v28, %v362_v30  ;;  %v93_v42 = vmul.f32 %v91_v28, %v364_v31  ;;  %v96_v43 = vmul.f32 %v95_v29, %v366_v32  ;;  %v97_v44 = vmul.f32 %v95_v29, %v368_v33 }
  0x24   :  { %v78_v45 = vadd.f32 %v76_v39, %v72_v37  ;;  %v79_v46 = vadd.f32 %v77_v40, %v73_v38  ;;  %v111_v47 = vmul.f32 %v110_v34, %v362_v30  ;;  %v112_v48 = vmul.f32 %v110_v34, %v364_v31  ;;  %p288_p9 = pnand %p287_p8, %p281_p5 }
  0x25   :  { %v98_v49 = vadd.f32 %v96_v43, %v92_v41  ;;  %v99_v50 = vadd.f32 %v97_v44, %v93_v42  ;;  %v115_v51 = vmul.f32 %v114_v35, %v366_v32  ;;  %v116_v52 = vmul.f32 %v114_v35, %v368_v33 }
  0x26   :  { %v83_v53 = vsel %vm82_vm1, %v79_v46, %v78_v45  ;;  %v145_v54 = vmul.f32 %v144_v36, %v362_v30  ;;  %v146_v55 = vmul.f32 %v144_v36, %v364_v31  ;;  %v149_v60 = vmul.f32 %v148_v56, %v366_v32 }
  0x27   :  { %85 = vrot.lane.b32.xlu0 %v83_v53, %s310_s3  ;;  %v102_v57 = vsel %vm82_vm1, %v99_v50, %v98_v49  ;;  %v117_v58 = vadd.f32 %v115_v51, %v111_v47  ;;  %v118_v59 = vadd.f32 %v116_v52, %v112_v48  ;;  %v150_v61 = vmul.f32 %v148_v56, %v368_v33 }
  0x28   :  { %v163_v62 = vstv %s354_s25  ;;  %v167_v63 = vstv %s360_s26  ;;  %v182_v0 = vstv %s370_s27  ;;  %v151_v2 = vadd.f32 %v149_v60, %v145_v54 }
  0x29   :  { %v121_v1 = vsel %vm82_vm1, %v118_v59, %v117_v58  ;;  %v164_v3 = vmul.f32 %v163_v62, %v362_v30  ;;  %v165_v4 = vmul.f32 %v163_v62, %v364_v31  ;;  %v152_v5 = vadd.f32 %v150_v61, %v146_v55 }
  0x2a   :  { %123 = vrot.lane.b32.xlu1 %v121_v1, %s311_s4  ;;  %v168_v6 = vmul.f32 %v167_v63, %v366_v32  ;;  %v169_v7 = vmul.f32 %v167_v63, %v368_v33  ;;  %v183_v8 = vmul.f32 %v182_v0, %v362_v30  ;;  %v184_v9 = vmul.f32 %v182_v0, %v364_v31 }
  0x2b   :  { %104 = vrot.lane.b32.xlu0 %v102_v57, %s312_s5  ;;  %v186_v10 = vstv %s375_s28  ;;  %v129_v11 = vstv %s381_s29  ;;  %v133_v12 = vstv %s387_s30  ;;  %v155_v13 = vsel %vm82_vm1, %v152_v5, %v151_v2 }
  0x2c   :  { %v170_v14 = vadd.f32 %v168_v6, %v164_v3  ;;  %v171_v15 = vadd.f32 %v169_v7, %v165_v4  ;;  %v187_v16 = vmul.f32 %v186_v10, %v366_v32  ;;  %v188_v17 = vmul.f32 %v186_v10, %v368_v33 }
  0x2d   :  { %v130_v18 = vmul.f32 %v129_v11, %v362_v30  ;;  %v131_v19 = vmul.f32 %v129_v11, %v364_v31  ;;  %v134_v20 = vmul.f32 %v133_v12, %v366_v32  ;;  %v135_v23 = vmul.f32 %v133_v12, %v368_v33 }
  0x2e   :  { %157 = vrot.lane.b32.xlu1 %v155_v13, %s313_s6  ;;  %v174_v21 = vsel %vm82_vm1, %v171_v15, %v170_v14  ;;  %v189_v22 = vadd.f32 %v187_v16, %v183_v8  ;;  %v190_v24 = vadd.f32 %v188_v17, %v184_v9  ;;  %v68_v29 = vlaneseq }
  0x2f   :  { %176 = vrot.lane.b32.xlu0 %v174_v21, %s314_s7  ;;  %v136_v25 = vadd.f32 %v134_v20, %v130_v18  ;;  %v137_v26 = vadd.f32 %v135_v23, %v131_v19 }
  0x30   :  { %v193_v27 = vsel %vm82_vm1, %v190_v24, %v189_v22  ;;  %v69_v30 = vand.u32 127, %v68_v29 }
  0x31   :  { %v140_v28 = vsel %vm82_vm1, %v137_v26, %v136_v25 }
  0x32   :  { %195 = vrot.lane.b32.xlu1 %v193_v27, %s315_s8  ;;  %vm87_vm2 = vcmp.ge.s32.totalorder %v69_v30, 3  ;;  %vm106_vm3 = vcmp.ge.s32.totalorder %v69_v30, 2  ;;  %vm125_vm4 = vcmp.ge.s32.totalorder %v69_v30, 1  ;;  %vm159_vm5 = vcmp.lt.s32.totalorder %v69_v30, 127 }
  0x33   :  { %vm178_vm6 = vcmp.lt.s32.totalorder %v69_v30, 126  ;;  %vm197_vm7 = vcmp.lt.s32.totalorder %v69_v30, 125 }
  0x99   :  { %v86_v31 = vpop.permute.xlu0 %85 }
  0x9a   :  { %v88_v33 = vsel %vm87_vm2, %v86_v31, 0.0 }
  0x9c   :  { %v124_v32 = vpop.permute.xlu1 %123 }
  0x9d   :  { %v105_v34 = vpop.permute.xlu0 %104  ;;  %v126_v36 = vsel %vm125_vm4, %v124_v32, 0.0 }
  0x9e   :  { %v107_v35 = vsel %vm106_vm3, %v105_v34, 0.0 }
  0x9f   :  { %v108_v37 = vadd.f32 %v107_v35, %v88_v33 }
  0xa0   :  { %v158_v38 = vpop.permute.xlu1 %157 }
  0xa1   :  { %v127_v39 = vadd.f32 %v126_v36, %v108_v37  ;;  %v177_v40 = vpop.permute.xlu0 %176  ;;  %v160_v41 = vsel %vm159_vm5, %v158_v38, 0.0 }
  0xa2   :  { %v179_v43 = vsel %vm178_vm6, %v177_v40, 0.0 }
  0xa3   :  { %v142_v42 = vadd.f32 %v140_v28, %v127_v39 }
  0xa4   :  { %v196_v44 = vpop.permute.xlu1 %195 }
  0xa5   :  { %v161_v45 = vadd.f32 %v160_v41, %v142_v42  ;;  %v198_v46 = vsel %vm197_vm7, %v196_v44, 0.0 }
  0xa7   :  { %v180_v47 = vadd.f32 %v179_v43, %v161_v45 }
  0xa9   :  { %v199_v48 = vadd.f32 %v198_v46, %v180_v47 }
  0xab   :  { %v236_v49 = vmul.f32 -1.442695, %v199_v48 }
  0xad   :  { %248 = vpow2.f32 %v236_v49 }
  0xba   :  { %v249_v50 = vpop.eup %248 }
  0xbb   :  { %v203_v51 = vadd.f32 1.0, %v249_v50 }
  0xbd   :  { %250 = vrcp.f32 %v203_v51 }
  0xca   :  { %v251_v52 = vpop.eup %250 }
  0xcb   :  { %206 = vst [vmem:[#allocation7] sm:$0x3] %v251_v52 }
  0xcc   :  { %291 = shalt.err (!%p288_p9)
}
  0xcd   :  { %216 = dma.vmem_to_hbm [thread:$0]  %s214_s10, 32, %s428_s2, [#allocation4]  }
  0xce   :  { %304 = dma.done.wait [#allocation4], 32  }
  0xcf   :  { %305 = vsyncadd [#allocation4], 4294967264 }
  0xd0   :  { %220 = vsyncpa [#allocation3], 1 }
  0xd1   :  { %221 = vsyncpa [#allocation4], 1 }
  0xd2   :  { %222 = vsyncpa [#allocation5], 1 }

</bundles_post_ra>
